<compile_context>
chip_gen: v7x
topology: tpu7x:2x2x1
jax: 0.10.0
libtpu: 0.0.40
codegen_flags: <defaults>
</compile_context>

<pallas_src>
import math
import numpy as np
import jax
import jax.numpy as jnp
from jax.experimental import pallas as pl
from jax.experimental.pallas import tpu as pltpu

# ---- hyper-params (small, synthetic) ----------------------------------------
PROTEIN_DIM = 32
HID_DIM     = 32
N_LAYERS    = 3
KERNEL_SIZE = 3                      # must be odd
PAD         = (KERNEL_SIZE - 1) // 2
SCALE       = math.sqrt(0.5)
LN_EPS      = 1e-5

B, L = 2, 16


# ---- Pallas kernel: fc -> [fused conv1d + GLU + residual]*n -> layernorm -----
# Layout inside the kernel: channel-major [C, B*L].
def encoder_kernel(x_ref, wfc_ref, bfc_ref, wconv_ref, bconv_ref, mask_ref,
                   gamma_ref, beta_ref, o_ref):
    H = HID_DIM
    BL = x_ref.shape[1]                                            # folded B*L

    # fc: [H, Dp] @ [Dp, B*L] -> [H, B*L]
    h = jnp.dot(wfc_ref[...], x_ref[...],
                preferred_element_type=jnp.float32) + bfc_ref[...]

    # TODO(synk): nn.Dropout is identity in eval mode; training-mode dropout RNG
    # not implemented.  (self.gn GroupNorm is unused in the reference forward().)
    for i in range(N_LAYERS):
        # im2col over kernel taps: shifted-in-sequence copies of h (lane roll on
        # the XLU) masked at sequence/batch boundaries, stacked along sublanes.
        taps = []
        for t in range(KERNEL_SIZE):
            d = t - PAD
            if d == 0:
                taps.append(h)
            else:
                sh = (-d) % BL                                     # positive static shift
                taps.append(pltpu.roll(h, shift=sh, axis=1) * mask_ref[t])
        xcat = jnp.concatenate(taps, axis=0)                       # [K*H, B*L]

        # One fat MXU matmul per layer: [2H, K*H] @ [K*H, B*L] + bias.
        y = jnp.dot(wconv_ref[i], xcat,
                    preferred_element_type=jnp.float32) + bconv_ref[i]

        a = y[:H, :]                                               # GLU value half
        g = y[H:, :]                                               # GLU gate half
        h = (a * jax.nn.sigmoid(g) + h) * SCALE                    # residual * sqrt(0.5)

    # LayerNorm over channels (axis 0 in this layout).
    mean = jnp.mean(h, axis=0, keepdims=True)
    var = jnp.mean((h - mean) ** 2, axis=0, keepdims=True)
    hn = (h - mean) * jax.lax.rsqrt(var + LN_EPS)
    o_ref[...] = hn * gamma_ref[...] + beta_ref[...]


# ---- wrapper ------------------------------------------------------------------
def encoder_pallas(protein, fc_w, fc_b, conv_w, conv_b, gamma, beta):
    Bn, Ln, Dp = protein.shape
    H = HID_DIM
    BL = Bn * Ln

    # Host-side repacking (layout plumbing, negligible):
    xT = protein.reshape(BL, Dp).T                                  # [Dp, B*L]
    bfc = fc_b.reshape(H, 1)
    # conv_w: [n, 2H, H, K] (PyTorch OIK) -> fused [n, 2H, K*H], tap-major rows.
    w_fused = jnp.transpose(conv_w, (0, 1, 3, 2)).reshape(
        N_LAYERS, 2 * H, KERNEL_SIZE * H)
    b_fused = conv_b.reshape(N_LAYERS, 2 * H, 1)
    gamma2 = gamma.reshape(H, 1)
    beta2 = beta.reshape(H, 1)

    # Per-tap validity masks over the folded sequence: zero-padding at sequence
    # ends AND no leakage across the folded batch boundary.
    pos = np.arange(BL) % Ln
    offs = np.arange(KERNEL_SIZE) - PAD
    masks_np = ((pos[None, :] + offs[:, None] >= 0) &
                (pos[None, :] + offs[:, None] < Ln)).astype(np.float32)
    masks = jnp.asarray(masks_np.reshape(KERNEL_SIZE, 1, BL))

    flops = int(2 * BL * (Dp * H + N_LAYERS * KERNEL_SIZE * H * 2 * H)
                + 10 * N_LAYERS * BL * H)
    transcendentals = int(N_LAYERS * BL * H + BL)
    bytes_accessed = int(4 * (xT.size + fc_w.size + bfc.size + w_fused.size
                              + b_fused.size + masks.size + gamma2.size
                              + beta2.size + H * BL))

    vmem_spec = pl.BlockSpec(memory_space=pltpu.MemorySpace.VMEM)
    out = pl.pallas_call(
        encoder_kernel,
        out_shape=jax.ShapeDtypeStruct((H, BL), jnp.float32),
        in_specs=[vmem_spec] * 8,
        out_specs=vmem_spec,
        cost_estimate=pl.CostEstimate(flops=flops,
                                      transcendentals=transcendentals,
                                      bytes_accessed=bytes_accessed),
    )(xT, fc_w, bfc, w_fused, b_fused, masks, gamma2, beta2)

    return out.T.reshape(Bn, Ln, H)                                 # back to [B, L, H]


# ---- pure-JAX reference (mirrors the PyTorch forward) ---------------------------
def encoder_ref(protein, fc_w, fc_b, conv_w, conv_b, gamma, beta):
    h = protein @ fc_w.T + fc_b                                     # [B, L, H]
    x = jnp.transpose(h, (0, 2, 1))                                 # [B, H, L]
    for i in range(N_LAYERS):
        y = jax.lax.conv_general_dilated(
            x, conv_w[i], window_strides=(1,), padding=[(PAD, PAD)],
            dimension_numbers=("NCH", "OIH", "NCH")) + conv_b[i][None, :, None]
        a, g = y[:, :HID_DIM], y[:, HID_DIM:]
        x = (a * jax.nn.sigmoid(g) + x) * SCALE
    h = jnp.transpose(x, (0, 2, 1))
    mean = h.mean(-1, keepdims=True)
    var = ((h - mean) ** 2).mean(-1, keepdims=True)
    return (h - mean) / jnp.sqrt(var + LN_EPS) * gamma + beta


if __name__ == "__main__":
    key = jax.random.PRNGKey(0)
    k = jax.random.split(key, 7)

    # deterministic synthetic parameters (PyTorch-shaped)
    fc_w   = jax.random.normal(k[0], (HID_DIM, PROTEIN_DIM), jnp.float32) * 0.1
    fc_b   = jax.random.normal(k[1], (HID_DIM,), jnp.float32) * 0.1
    conv_w = jax.random.normal(k[2], (N_LAYERS, 2 * HID_DIM, HID_DIM, KERNEL_SIZE),
                               jnp.float32) * 0.1
    conv_b = jax.random.normal(k[3], (N_LAYERS, 2 * HID_DIM), jnp.float32) * 0.1
    gamma  = 1.0 + jax.random.normal(k[4], (HID_DIM,), jnp.float32) * 0.1
    beta   = jax.random.normal(k[5], (HID_DIM,), jnp.float32) * 0.1
    # NOTE: self.gn (GroupNorm) in the PyTorch module is unused in forward().

    protein = jax.random.normal(k[6], (B, L, PROTEIN_DIM), jnp.float32)

    out = encoder_pallas(protein, fc_w, fc_b, conv_w, conv_b, gamma, beta)
    out = jax.block_until_ready(out)

    ref = encoder_ref(protein, fc_w, fc_b, conv_w, conv_b, gamma, beta)
    np.testing.assert_allclose(np.asarray(out), np.asarray(ref), atol=2e-4, rtol=2e-4)

    print("KERNEL_OK")
</pallas_src>

<mosaic_0001>
module attributes {stable_mosaic.version = 11 : i64} {
  func.func @encoder_kernel(%arg0: memref<32x32xf32, #tpu.memory_space<vmem>>, %arg1: memref<32x32xf32, #tpu.memory_space<vmem>>, %arg2: memref<32x1xf32, #tpu.memory_space<vmem>>, %arg3: memref<3x64x96xf32, #tpu.memory_space<vmem>>, %arg4: memref<3x64x1xf32, #tpu.memory_space<vmem>>, %arg5: memref<3x1x32xf32, #tpu.memory_space<vmem>>, %arg6: memref<32x1xf32, #tpu.memory_space<vmem>>, %arg7: memref<32x1xf32, #tpu.memory_space<vmem>>, %arg8: memref<32x32xf32, #tpu.memory_space<vmem>>) attributes {dimension_semantics = [], scalar_prefetch = 0 : i64, scratch_operands = 0 : i64, tpu.core_type = #tpu.core_type<tc>} {
    %c0 = arith.constant 0 : index
    %c0_0 = arith.constant 0 : index
    %0 = vector.load %arg1[%c0, %c0_0] : memref<32x32xf32, #tpu.memory_space<vmem>>, vector<32x32xf32>
    %c0_1 = arith.constant 0 : index
    %c0_2 = arith.constant 0 : index
    %1 = vector.load %arg0[%c0_1, %c0_2] : memref<32x32xf32, #tpu.memory_space<vmem>>, vector<32x32xf32>
    %cst = arith.constant dense<0.000000e+00> : vector<32x32xf32>
    %2 = tpu.matmul %0, %1, %cst {dimension_numbers = #tpu.dot_dimension_numbers<[1], [0], [0], [1], [0, 0, 1, 1], [], []>} : vector<32x32xf32>, vector<32x32xf32>, vector<32x32xf32> -> vector<32x32xf32>
    %c0_3 = arith.constant 0 : index
    %c0_4 = arith.constant 0 : index
    %3 = vector.load %arg2[%c0_3, %c0_4] : memref<32x1xf32, #tpu.memory_space<vmem>>, vector<32x1xf32>
    %4 = vector.broadcast %3 : vector<32x1xf32> to vector<32x32xf32>
    %5 = arith.addf %2, %4 : vector<32x32xf32>
    %c1_i32 = arith.constant 1 : i32
    %6 = tpu.dynamic_rotate %5 by %c1_i32 dim 1 : vector<32x32xf32>, i32 -> vector<32x32xf32>
    %c0_5 = arith.constant 0 : index
    %c0_6 = arith.constant 0 : index
    %c0_7 = arith.constant 0 : index
    %7 = vector.load %arg5[%c0_5, %c0_6, %c0_7] : memref<3x1x32xf32, #tpu.memory_space<vmem>>, vector<1x1x32xf32>
    %8 = vector.shape_cast %7 : vector<1x1x32xf32> to vector<1x32xf32>
    %9 = vector.broadcast %8 : vector<1x32xf32> to vector<32x32xf32>
    %10 = arith.mulf %6, %9 : vector<32x32xf32>
    %c31_i32 = arith.constant 31 : i32
    %11 = tpu.dynamic_rotate %5 by %c31_i32 dim 1 : vector<32x32xf32>, i32 -> vector<32x32xf32>
    %c2 = arith.constant 2 : index
    %c0_8 = arith.constant 0 : index
    %c0_9 = arith.constant 0 : index
    %12 = vector.load %arg5[%c2, %c0_8, %c0_9] : memref<3x1x32xf32, #tpu.memory_space<vmem>>, vector<1x1x32xf32>
    %13 = vector.shape_cast %12 : vector<1x1x32xf32> to vector<1x32xf32>
    %14 = vector.broadcast %13 : vector<1x32xf32> to vector<32x32xf32>
    %15 = arith.mulf %11, %14 : vector<32x32xf32>
    %16 = tpu.concatenate %10, %5, %15 in 0 : vector<32x32xf32>, vector<32x32xf32>, vector<32x32xf32> -> vector<96x32xf32>
    %c0_10 = arith.constant 0 : index
    %c0_11 = arith.constant 0 : index
    %c0_12 = arith.constant 0 : index
    %17 = vector.load %arg3[%c0_10, %c0_11, %c0_12] : memref<3x64x96xf32, #tpu.memory_space<vmem>>, vector<1x64x96xf32>
    %18 = vector.shape_cast %17 : vector<1x64x96xf32> to vector<64x96xf32>
    %cst_13 = arith.constant dense<0.000000e+00> : vector<64x32xf32>
    %19 = tpu.matmul %18, %16, %cst_13 {dimension_numbers = #tpu.dot_dimension_numbers<[1], [0], [0], [1], [0, 0, 1, 1], [], []>} : vector<64x96xf32>, vector<96x32xf32>, vector<64x32xf32> -> vector<64x32xf32>
    %c0_14 = arith.constant 0 : index
    %c0_15 = arith.constant 0 : index
    %c0_16 = arith.constant 0 : index
    %20 = vector.load %arg4[%c0_14, %c0_15, %c0_16] : memref<3x64x1xf32, #tpu.memory_space<vmem>>, vector<1x64x1xf32>
    %21 = vector.shape_cast %20 : vector<1x64x1xf32> to vector<64x1xf32>
    %22 = vector.broadcast %21 : vector<64x1xf32> to vector<64x32xf32>
    %23 = arith.addf %19, %22 : vector<64x32xf32>
    %24 = vector.extract_strided_slice %23 {offsets = [0, 0], sizes = [32, 32], strides = [1, 1]} : vector<64x32xf32> to vector<32x32xf32>
    %25 = vector.extract_strided_slice %23 {offsets = [32, 0], sizes = [32, 32], strides = [1, 1]} : vector<64x32xf32> to vector<32x32xf32>
    %26 = arith.negf %25 : vector<32x32xf32>
    %27 = math.exp %26 : vector<32x32xf32>
    %cst_17 = arith.constant 1.000000e+00 : f32
    %28 = vector.broadcast %cst_17 : f32 to vector<32x32xf32>
    %29 = arith.addf %28, %27 : vector<32x32xf32>
    %30 = arith.divf %28, %29 : vector<32x32xf32>
    %31 = arith.mulf %24, %30 : vector<32x32xf32>
    %32 = arith.addf %31, %5 : vector<32x32xf32>
    %cst_18 = arith.constant 0.707106769 : f32
    %33 = vector.broadcast %cst_18 : f32 to vector<32x32xf32>
    %34 = arith.mulf %32, %33 : vector<32x32xf32>
    %c1_i32_19 = arith.constant 1 : i32
    %35 = tpu.dynamic_rotate %34 by %c1_i32_19 dim 1 : vector<32x32xf32>, i32 -> vector<32x32xf32>
    %c0_20 = arith.constant 0 : index
    %c0_21 = arith.constant 0 : index
    %c0_22 = arith.constant 0 : index
    %36 = vector.load %arg5[%c0_20, %c0_21, %c0_22] : memref<3x1x32xf32, #tpu.memory_space<vmem>>, vector<1x1x32xf32>
    %37 = vector.shape_cast %36 : vector<1x1x32xf32> to vector<1x32xf32>
    %38 = vector.broadcast %37 : vector<1x32xf32> to vector<32x32xf32>
    %39 = arith.mulf %35, %38 : vector<32x32xf32>
    %c31_i32_23 = arith.constant 31 : i32
    %40 = tpu.dynamic_rotate %34 by %c31_i32_23 dim 1 : vector<32x32xf32>, i32 -> vector<32x32xf32>
    %c2_24 = arith.constant 2 : index
    %c0_25 = arith.constant 0 : index
    %c0_26 = arith.constant 0 : index
    %41 = vector.load %arg5[%c2_24, %c0_25, %c0_26] : memref<3x1x32xf32, #tpu.memory_space<vmem>>, vector<1x1x32xf32>
    %42 = vector.shape_cast %41 : vector<1x1x32xf32> to vector<1x32xf32>
    %43 = vector.broadcast %42 : vector<1x32xf32> to vector<32x32xf32>
    %44 = arith.mulf %40, %43 : vector<32x32xf32>
    %45 = tpu.concatenate %39, %34, %44 in 0 : vector<32x32xf32>, vector<32x32xf32>, vector<32x32xf32> -> vector<96x32xf32>
    %c1 = arith.constant 1 : index
    %c0_27 = arith.constant 0 : index
    %c0_28 = arith.constant 0 : index
    %46 = vector.load %arg3[%c1, %c0_27, %c0_28] : memref<3x64x96xf32, #tpu.memory_space<vmem>>, vector<1x64x96xf32>
    %47 = vector.shape_cast %46 : vector<1x64x96xf32> to vector<64x96xf32>
    %cst_29 = arith.constant dense<0.000000e+00> : vector<64x32xf32>
    %48 = tpu.matmul %47, %45, %cst_29 {dimension_numbers = #tpu.dot_dimension_numbers<[1], [0], [0], [1], [0, 0, 1, 1], [], []>} : vector<64x96xf32>, vector<96x32xf32>, vector<64x32xf32> -> vector<64x32xf32>
    %c1_30 = arith.constant 1 : index
    %c0_31 = arith.constant 0 : index
    %c0_32 = arith.constant 0 : index
    %49 = vector.load %arg4[%c1_30, %c0_31, %c0_32] : memref<3x64x1xf32, #tpu.memory_space<vmem>>, vector<1x64x1xf32>
    %50 = vector.shape_cast %49 : vector<1x64x1xf32> to vector<64x1xf32>
    %51 = vector.broadcast %50 : vector<64x1xf32> to vector<64x32xf32>
    %52 = arith.addf %48, %51 : vector<64x32xf32>
    %53 = vector.extract_strided_slice %52 {offsets = [0, 0], sizes = [32, 32], strides = [1, 1]} : vector<64x32xf32> to vector<32x32xf32>
    %54 = vector.extract_strided_slice %52 {offsets = [32, 0], sizes = [32, 32], strides = [1, 1]} : vector<64x32xf32> to vector<32x32xf32>
    %55 = arith.negf %54 : vector<32x32xf32>
    %56 = math.exp %55 : vector<32x32xf32>
    %cst_33 = arith.constant 1.000000e+00 : f32
    %57 = vector.broadcast %cst_33 : f32 to vector<32x32xf32>
    %58 = arith.addf %57, %56 : vector<32x32xf32>
    %59 = arith.divf %57, %58 : vector<32x32xf32>
    %60 = arith.mulf %53, %59 : vector<32x32xf32>
    %61 = arith.addf %60, %34 : vector<32x32xf32>
    %cst_34 = arith.constant 0.707106769 : f32
    %62 = vector.broadcast %cst_34 : f32 to vector<32x32xf32>
    %63 = arith.mulf %61, %62 : vector<32x32xf32>
    %c1_i32_35 = arith.constant 1 : i32
    %64 = tpu.dynamic_rotate %63 by %c1_i32_35 dim 1 : vector<32x32xf32>, i32 -> vector<32x32xf32>
    %c0_36 = arith.constant 0 : index
    %c0_37 = arith.constant 0 : index
    %c0_38 = arith.constant 0 : index
    %65 = vector.load %arg5[%c0_36, %c0_37, %c0_38] : memref<3x1x32xf32, #tpu.memory_space<vmem>>, vector<1x1x32xf32>
    %66 = vector.shape_cast %65 : vector<1x1x32xf32> to vector<1x32xf32>
    %67 = vector.broadcast %66 : vector<1x32xf32> to vector<32x32xf32>
    %68 = arith.mulf %64, %67 : vector<32x32xf32>
    %c31_i32_39 = arith.constant 31 : i32
    %69 = tpu.dynamic_rotate %63 by %c31_i32_39 dim 1 : vector<32x32xf32>, i32 -> vector<32x32xf32>
    %c2_40 = arith.constant 2 : index
    %c0_41 = arith.constant 0 : index
    %c0_42 = arith.constant 0 : index
    %70 = vector.load %arg5[%c2_40, %c0_41, %c0_42] : memref<3x1x32xf32, #tpu.memory_space<vmem>>, vector<1x1x32xf32>
    %71 = vector.shape_cast %70 : vector<1x1x32xf32> to vector<1x32xf32>
    %72 = vector.broadcast %71 : vector<1x32xf32> to vector<32x32xf32>
    %73 = arith.mulf %69, %72 : vector<32x32xf32>
    %74 = tpu.concatenate %68, %63, %73 in 0 : vector<32x32xf32>, vector<32x32xf32>, vector<32x32xf32> -> vector<96x32xf32>
    %c2_43 = arith.constant 2 : index
    %c0_44 = arith.constant 0 : index
    %c0_45 = arith.constant 0 : index
    %75 = vector.load %arg3[%c2_43, %c0_44, %c0_45] : memref<3x64x96xf32, #tpu.memory_space<vmem>>, vector<1x64x96xf32>
    %76 = vector.shape_cast %75 : vector<1x64x96xf32> to vector<64x96xf32>
    %cst_46 = arith.constant dense<0.000000e+00> : vector<64x32xf32>
    %77 = tpu.matmul %76, %74, %cst_46 {dimension_numbers = #tpu.dot_dimension_numbers<[1], [0], [0], [1], [0, 0, 1, 1], [], []>} : vector<64x96xf32>, vector<96x32xf32>, vector<64x32xf32> -> vector<64x32xf32>
    %c2_47 = arith.constant 2 : index
    %c0_48 = arith.constant 0 : index
    %c0_49 = arith.constant 0 : index
    %78 = vector.load %arg4[%c2_47, %c0_48, %c0_49] : memref<3x64x1xf32, #tpu.memory_space<vmem>>, vector<1x64x1xf32>
    %79 = vector.shape_cast %78 : vector<1x64x1xf32> to vector<64x1xf32>
    %80 = vector.broadcast %79 : vector<64x1xf32> to vector<64x32xf32>
    %81 = arith.addf %77, %80 : vector<64x32xf32>
    %82 = vector.extract_strided_slice %81 {offsets = [0, 0], sizes = [32, 32], strides = [1, 1]} : vector<64x32xf32> to vector<32x32xf32>
    %83 = vector.extract_strided_slice %81 {offsets = [32, 0], sizes = [32, 32], strides = [1, 1]} : vector<64x32xf32> to vector<32x32xf32>
    %84 = arith.negf %83 : vector<32x32xf32>
    %85 = math.exp %84 : vector<32x32xf32>
    %cst_50 = arith.constant 1.000000e+00 : f32
    %86 = vector.broadcast %cst_50 : f32 to vector<32x32xf32>
    %87 = arith.addf %86, %85 : vector<32x32xf32>
    %88 = arith.divf %86, %87 : vector<32x32xf32>
    %89 = arith.mulf %82, %88 : vector<32x32xf32>
    %90 = arith.addf %89, %63 : vector<32x32xf32>
    %cst_51 = arith.constant 0.707106769 : f32
    %91 = vector.broadcast %cst_51 : f32 to vector<32x32xf32>
    %92 = arith.mulf %90, %91 : vector<32x32xf32>
    %cst_52 = arith.constant dense<0.000000e+00> : vector<32xf32>
    %93 = vector.multi_reduction <add>, %92, %cst_52 [0] : vector<32x32xf32> to vector<32xf32>
    %94 = vector.shape_cast %93 : vector<32xf32> to vector<1x32xf32>
    %cst_53 = arith.constant 3.200000e+01 : f32
    %95 = vector.broadcast %cst_53 : f32 to vector<1x32xf32>
    %96 = arith.divf %94, %95 : vector<1x32xf32>
    %97 = vector.broadcast %96 : vector<1x32xf32> to vector<32x32xf32>
    %98 = arith.subf %92, %97 : vector<32x32xf32>
    %99 = arith.mulf %98, %98 : vector<32x32xf32>
    %cst_54 = arith.constant dense<0.000000e+00> : vector<32xf32>
    %100 = vector.multi_reduction <add>, %99, %cst_54 [0] : vector<32x32xf32> to vector<32xf32>
    %101 = vector.shape_cast %100 : vector<32xf32> to vector<1x32xf32>
    %cst_55 = arith.constant 3.200000e+01 : f32
    %102 = vector.broadcast %cst_55 : f32 to vector<1x32xf32>
    %103 = arith.divf %101, %102 : vector<1x32xf32>
    %104 = vector.broadcast %96 : vector<1x32xf32> to vector<32x32xf32>
    %105 = arith.subf %92, %104 : vector<32x32xf32>
    %cst_56 = arith.constant 9.99999974E-6 : f32
    %106 = vector.broadcast %cst_56 : f32 to vector<1x32xf32>
    %107 = arith.addf %103, %106 : vector<1x32xf32>
    %108 = math.rsqrt %107 : vector<1x32xf32>
    %109 = vector.broadcast %108 : vector<1x32xf32> to vector<32x32xf32>
    %110 = arith.mulf %105, %109 : vector<32x32xf32>
    %c0_57 = arith.constant 0 : index
    %c0_58 = arith.constant 0 : index
    %111 = vector.load %arg6[%c0_57, %c0_58] : memref<32x1xf32, #tpu.memory_space<vmem>>, vector<32x1xf32>
    %112 = vector.broadcast %111 : vector<32x1xf32> to vector<32x32xf32>
    %113 = arith.mulf %110, %112 : vector<32x32xf32>
    %c0_59 = arith.constant 0 : index
    %c0_60 = arith.constant 0 : index
    %114 = vector.load %arg7[%c0_59, %c0_60] : memref<32x1xf32, #tpu.memory_space<vmem>>, vector<32x1xf32>
    %115 = vector.broadcast %114 : vector<32x1xf32> to vector<32x32xf32>
    %116 = arith.addf %113, %115 : vector<32x32xf32>
    %c0_61 = arith.constant 0 : index
    %c0_62 = arith.constant 0 : index
    %117 = vector.load %arg8[%c0_61, %c0_62] : memref<32x32xf32, #tpu.memory_space<vmem>>, vector<32x32xf32>
    tpu.vector_store %arg8[%c0_61, %c0_62], %116 {strides = array<i32>} : memref<32x32xf32, #tpu.memory_space<vmem>>, vector<32x32xf32>,
    return
  }
}

</mosaic_0001>

<bundles_post_ra>
// kernel: tpu_custom_call.1
= control target key start
LH: loop header
LB: loop body
LE: loop exit
PB: predicated region body
PF: predicated region fallthrough
CT: control target
= control target key end

     0   :  { %vm62_vm0 = vcmask 261120   ;;  %v1847_v6 = vmov 0   ;;  %s2354_s0 = inlined_call_operand.vmem [shape: f32[32,32], index: 0, kind: input, shape index: {}]   ;;  %s2355_s1 = inlined_call_operand.vmem [shape: f32[32,32], index: 1, kind: input, shape index: {}]   ;;  %s2356_s2 = inlined_call_operand.vmem [shape: f32[32,1], index: 2, kind: input, shape index: {}]   ;;  %s2357_s3 = inlined_call_operand.vmem [shape: f32[3,64,96], index: 3, kind: input, shape index: {}]   ;;  %s2358_s4 = inlined_call_operand.vmem [shape: f32[3,64,1], index: 4, kind: input, shape index: {}]   ;;  %s2359_s5 = inlined_call_operand.vmem [shape: f32[3,1,32], index: 5, kind: input, shape index: {}]   ;;  %s2360_s6 = inlined_call_operand.vmem [shape: f32[32,1], index: 6, kind: input, shape index: {}]   ;;  %s2361_s7 = inlined_call_operand.vmem [shape: f32[32,1], index: 7, kind: input, shape index: {}]   ;;  %s2362_s8 = inlined_call_operand.hbm [shape: f32[32,32], index: 8, kind: output, shape index: {}]  }
   0x1   :  { %v34_v0 = vld [vmem:[%s2354_s0] sm:$0xff]  ;;  %v35_v1 = vld [vmem:[%s2354_s0 + $0x8] sm:$0xff]  ;;  %v36_v2 = vld [vmem:[%s2354_s0 + $0x10] sm:$0xff]  ;;  %1621 = vset.pattern.permute.xlu0 %v1847_v6  ;;  %1622 = vset.pattern.permute.xlu1 %v1847_v6 }
   0x2   :  { %v1520_v3 = vpack.c.bf16 %v35_v1, %v34_v0  ;;  %v37_v4 = vld [vmem:[%s2354_s0 + $0x18] sm:$0xff]  ;;  %v30_v5 = vld [vmem:[%s2355_s1] sm:$0xff]  ;;  %v40_v9 = vld [vmem:[%s2356_s2 + $0x10] sm:$0xff] }
   0x3   :  { %v1524_v7 = vpack.c.bf16 %v37_v4, %v36_v2  ;;  %1406 = vmatprep.mubr.msk.f32.mxu0 %vm62_vm0, %v30_v5  ;;  %v38_v8 = vld [vmem:[%s2356_s2] sm:$0xff]  ;;  %54 = vperm.xlu1 %1622, %v40_v9   ;;  %v39_v10 = vld [vmem:[%s2356_s2 + $0x8] sm:$0xff] }
   0x4   :  { %1521 = vmatprep.subr.bf16.mxu0 %v1520_v3  ;;  %44 = vperm.xlu0 %1621, %v38_v8  }
   0x5   :  { %1523 = vmatpush3.bf16.msra.mxu0 %v1520_v3 }
   0x6   :  { %13 = vsyncpa [#allocation3], 0  ;;  %1525 = vmatprep.subr.bf16.mxu0 %v1524_v7  ;;  %v41_v11 = vld [vmem:[%s2356_s2 + $0x18] sm:$0xff]  ;;  %v31_v12 = vld [vmem:[%s2355_s1 + $0x8] sm:$0xff]  ;;  %s1848_s2 = smov 32   ;;  %s1849_s29 = smov 1  }
   0x7   :  { %59 = vperm.xlu1 %1622, %v41_v11   ;;  %v32_v13 = vld [vmem:[%s2355_s1 + $0x10] sm:$0xff]  ;;  %v33_v14 = vld [vmem:[%s2355_s1 + $0x18] sm:$0xff]  ;;  %v1261_v27 = vld [vmem:[%s2359_s5 + $0x2] ss:$0 sm:$0xff]  ;;  %vm160_vm1 = vcmask 1047808   ;;  %s1850_s10 = smov 31  }
   0x8   :  { %49 = vperm.xlu0 %1621, %v39_v10   ;;  %v1259_v36 = vld [vmem:[%s2359_s5] ss:$0 sm:$0xff]  ;;  %s1851_s5 = smov 30   ;;  %s1852_s11 = smov 97   ;;  %vm332_vm2 = vcmask 785408   ;;  %v249_v10 = vld [vmem:[%s2358_s4 + $0x28] sm:$0xff] }
   0x9   :  { %1527 = vmatpush3.bf16.msra.mxu0 %v1524_v7  ;;  %v236_v0 = vld [vmem:[%s2357_s3] sm:$0xff] }
   0xa   :  { %1436 = vmatprep.mubr.msk.f32.mxu1 %vm332_vm2, %v236_v0  ;;  %v248_v2 = vld [vmem:[%s2358_s4 + $0x20] sm:$0xff] }
   0xc   :  { %1407 = vmatmul.mubr.msk.f32.vlgmr.msra.gmra.mrb[0].mxu0 %vm62_vm0, %v31_v12 }
   0xd   :  { %1409 = vmatprep.mubr.msk.f32.mxu0 %vm62_vm0, %v32_v13  ;;  %v250_v13 = vld [vmem:[%s2358_s4 + $0x30] sm:$0xff] }
  0x10   :  { %1410 = vmatmul.mubr.msk.f32.gmra.mrb[2].mxu0 %vm62_vm0, %v33_v14 }
  0x82   :  { %v55_v16 = vpop.permute.xlu1 %54 }
  0x83   :  { %v45_v15 = vpop.permute.xlu0 %44 }
  0x86   :  { %v60_v22 = vpop.permute.xlu1 %59 }
  0x87   :  { %v50_v17 = vpop.permute.xlu0 %49 }
  0xdf   :  { %v1408_v18 = vpop.f32.mrb[0].mxu0 }
  0xe0   :  { %v1941_v19 = vadd.f32 %v1408_v18, %v50_v17  ;;  %v141_v20 = vpop.f32.mrb[1].mxu0  ;;  %v251_v17 = vld [vmem:[%s2358_s4 + $0x38] sm:$0xff]  ;;  %v244_v18 = vld [vmem:[%s2358_s4] sm:$0xff] }
  0xe1   :  { %v1943_v21 = vadd.f32 %v141_v20, %v45_v15 }
  0xe2   :  { %164 = vrot.lane.b32.xlu1 %v1941_v19, %s1848_s2 }
  0xe3   :  { %v1411_v23 = vpop.f32.mrb[2].mxu0  ;;  %161 = vrot.lane.b32.xlu0 %v1943_v21, %s1848_s2  ;;  %v1623_v37 = vpack.i.bf16 %v1941_v19, %v1943_v21 }
  0xe4   :  { %v1949_v24 = vadd.f32 %v1411_v23, %v60_v22  ;;  %v151_v25 = vpop.f32.mrb[3].mxu0 }
  0xe5   :  { %v1951_v26 = vadd.f32 %v151_v25, %v55_v16  ;;  %v245_v25 = vld [vmem:[%s2358_s4 + $0x8] sm:$0xff] }
  0xe6   :  { %170 = vrot.lane.b32.xlu1 %v1949_v24, %s1848_s2 }
  0xe7   :  { %167 = vrot.lane.b32.xlu0 %v1951_v26, %s1848_s2  ;;  %v1628_v38 = vpack.i.bf16 %v1949_v24, %v1951_v26 }
  0xeb   :  { %205 = vrot.lane.b32.xlu0 %v1261_v27, %s1849_s29  ;;  %v246_v27 = vld [vmem:[%s2358_s4 + $0x10] sm:$0xff] }
 0x154   :  { %v165_v28 = vpop.permute.xlu1 %164 }
 0x155   :  { %v162_v29 = vpop.permute.xlu0 %161  ;;  %v166_v30 = vsel %vm160_vm1, %v165_v28, %v1941_v19 }
 0x156   :  { %175 = vrot.lane.b32.xlu1 %v166_v30, %s1848_s2  ;;  %v163_v31 = vsel %vm160_vm1, %v162_v29, %v1943_v21  ;;  %v247_v29 = vld [vmem:[%s2358_s4 + $0x18] sm:$0xff] }
 0x157   :  { %173 = vrot.lane.b32.xlu0 %v163_v31, %s1848_s2 }
 0x158   :  { %v171_v32 = vpop.permute.xlu1 %170 }
 0x159   :  { %v168_v33 = vpop.permute.xlu0 %167  ;;  %v172_v34 = vsel %vm160_vm1, %v171_v32, %v1949_v24 }
 0x15a   :  { %v169_v35 = vsel %vm160_vm1, %v168_v33, %v1951_v26 }
 0x15b   :  { %179 = vrot.lane.b32.xlu0 %v172_v34, %s1848_s2  ;;  %177 = vrot.lane.b32.xlu1 %v169_v35, %s1848_s2 }
 0x15d   :  { %v1982_v39 = vpop.permute.xlu0 %205 }
 0x15f   :  { %1624 = vrot.lane.b32.xlu0 %v1623_v37, %s1850_s10  ;;  %191 = vrot.lane.b32.xlu1 %v1259_v36, %s1850_s10 }
 0x163   :  { %1629 = vrot.lane.b32.xlu1 %v1628_v38, %s1850_s10  ;;  %v237_v38 = vld [vmem:[%s2357_s3 + $0x8] sm:$0xff] }
 0x1c8   :  { %v176_v40 = vpop.permute.xlu1 %175 }
 0x1c9   :  { %v182_v41 = vsel %vm160_vm1, %v176_v40, %v1941_v19  ;;  %v174_v42 = vpop.permute.xlu0 %173  ;;  %v238_v40 = vld [vmem:[%s2357_s3 + $0x10] sm:$0xff] }
 0x1ca   :  { %v209_v43 = vmul.f32 %v1982_v39, %v182_v41  ;;  %v181_v44 = vsel %vm160_vm1, %v174_v42, %v1943_v21  ;;  %v240_v42 = vld [vmem:[%s2357_s3 + $0x20] sm:$0xff] }
 0x1cb   :  { %v208_v45 = vmul.f32 %v1982_v39, %v181_v44 }
 0x1cd   :  { %v178_v46 = vpop.permute.xlu1 %177  ;;  %v180_v47 = vpop.permute.xlu0 %179  ;;  %v1633_v48 = vpack.i.bf16 %v209_v43, %v208_v45  ;;  %v241_v43 = vld [vmem:[%s2357_s3 + $0x28] sm:$0xff]  ;;  %v243_v45 = vld [vmem:[%s2357_s3 + $0x38] sm:$0xff] }
 0x1ce   :  { %v183_v49 = vsel %vm160_vm1, %v178_v46, %v1951_v26  ;;  %v184_v50 = vsel %vm160_vm1, %v180_v47, %v1949_v24 }
 0x1cf   :  { %v210_v51 = vmul.f32 %v1982_v39, %v183_v49  ;;  %v211_v52 = vmul.f32 %v1982_v39, %v184_v50  ;;  %1634 = vrot.lane.b32.xlu0 %v1633_v48, %s1851_s5 }
 0x1d1   :  { %v1997_v53 = vpop.permute.xlu1 %191  ;;  %v1625_v54 = vpop.permute.xlu0 %1624  ;;  %v1638_v55 = vpack.i.bf16 %v211_v52, %v210_v51 }
 0x1d2   :  { %v194_v56 = vmul.f32 %v1997_v53, %v181_v44  ;;  %v195_v57 = vmul.f32 %v1997_v53, %v182_v41  ;;  %v196_v58 = vmul.f32 %v1997_v53, %v183_v49  ;;  %v197_v59 = vmul.f32 %v1997_v53, %v184_v50  ;;  %v239_v41 = vld [vmem:[%s2357_s3 + $0x18] sm:$0xff]  ;;  %v242_v44 = vld [vmem:[%s2357_s3 + $0x30] sm:$0xff] }
 0x1d3   :  { %1639 = vrot.lane.b32.xlu1 %v1638_v55, %s1851_s5 }
 0x1d4   :  { %v1643_v60 = vpack.i.bf16 %v195_v57, %v194_v56  ;;  %v1648_v62 = vpack.i.bf16 %v197_v59, %v196_v58 }
 0x1d5   :  { %v1630_v61 = vpop.permute.xlu1 %1629 }
 0x1d6   :  { %1644 = vrot.lane.b32.xlu0 %v1643_v60, %s1852_s11 }
 0x1d7   :  { %1649 = vrot.lane.b32.xlu1 %v1648_v62, %s1852_s11 }
 0x1da   :  { %1654 = vrot.lane.b32.xlu0 %v1625_v54, %s1852_s11 }
 0x1db   :  { %1659 = vrot.lane.b32.xlu1 %v1630_v61, %s1852_s11 }
 0x241   :  { %v1635_v63 = vpop.permute.xlu0 %1634 }
 0x242   :  { %1664 = vrot.lane.b32.xlu0 %v1635_v63, %s1852_s11 }
 0x245   :  { %v1640_v1 = vpop.permute.xlu1 %1639 }
 0x246   :  { %1669 = vrot.lane.b32.xlu1 %v1640_v1, %s1852_s11  ;;  %274 = vperm.xlu0 %1621, %v248_v2  }
 0x248   :  { %v1645_v3 = vpop.permute.xlu0 %1644 }
 0x249   :  { %v1647_v4 = vunpack.i.h.bf16 %v1645_v3  ;;  %v1646_v5 = vunpack.i.l.bf16 %v1645_v3  ;;  %v1650_v6 = vpop.permute.xlu1 %1649 }
 0x24a   :  { %v1652_v7 = vunpack.i.h.bf16 %v1650_v6  ;;  %v1651_v8 = vunpack.i.l.bf16 %v1650_v6  ;;  %279 = vperm.xlu1 %1622, %v249_v10   ;;  %284 = vperm.xlu0 %1621, %v250_v13  }
 0x24b   :  { %v1528_v9 = vpack.c.bf16 %v1647_v4, %v1646_v5 }
 0x24c   :  { %v1532_v11 = vpack.c.bf16 %v1652_v7, %v1651_v8  ;;  %v1655_v12 = vpop.permute.xlu0 %1654 }
 0x24d   :  { %v1657_v14 = vunpack.i.h.bf16 %v1655_v12  ;;  %v1656_v15 = vunpack.i.l.bf16 %v1655_v12  ;;  %1529 = vmatprep.subr.bf16.mxu1 %v1528_v9  ;;  %v1660_v16 = vpop.permute.xlu1 %1659 }
 0x24e   :  { %1531 = vmatpush3.bf16.msra.mxu1 %v1528_v9  ;;  %v1662_v22 = vunpack.i.h.bf16 %v1660_v16  ;;  %v1661_v23 = vunpack.i.l.bf16 %v1660_v16  ;;  %289 = vperm.xlu1 %1622, %v251_v17  }
 0x24f   :  { %1533 = vmatprep.subr.bf16.mxu1 %v1532_v11  ;;  %v1536_v20 = vpack.c.bf16 %v1657_v14, %v1656_v15  ;;  %254 = vperm.xlu0 %1621, %v244_v18  }
 0x250   :  { %v1540_v28 = vpack.c.bf16 %v1662_v22, %v1661_v23 }
 0x252   :  { %1535 = vmatpush3.bf16.msra.mxu1 %v1532_v11  ;;  %259 = vperm.xlu1 %1622, %v245_v25  }
 0x253   :  { %1537 = vmatprep.subr.bf16.mxu1 %v1536_v20  ;;  %264 = vperm.xlu0 %1621, %v246_v27  }
 0x256   :  { %1539 = vmatpush3.bf16.msra.mxu1 %v1536_v20  ;;  %269 = vperm.xlu1 %1622, %v247_v29  }
 0x257   :  { %1541 = vmatprep.subr.bf16.mxu1 %v1540_v28 }
 0x25a   :  { %1543 = vmatpush3.bf16.msra.mxu1 %v1540_v28 }
 0x2b4   :  { %v1665_v30 = vpop.permute.xlu0 %1664 }
 0x2b5   :  { %v1667_v31 = vunpack.i.h.bf16 %v1665_v30  ;;  %v1666_v32 = vunpack.i.l.bf16 %v1665_v30 }
 0x2b7   :  { %v1544_v33 = vpack.c.bf16 %v1667_v31, %v1666_v32 }
 0x2b8   :  { %v1670_v34 = vpop.permute.xlu1 %1669 }
 0x2b9   :  { %v1672_v35 = vunpack.i.h.bf16 %v1670_v34  ;;  %v1671_v36 = vunpack.i.l.bf16 %v1670_v34  ;;  %1545 = vmatprep.subr.bf16.mxu1 %v1544_v33 }
 0x2ba   :  { %1547 = vmatpush3.bf16.msra.mxu1 %v1544_v33 }
 0x2bb   :  { %v1548_v37 = vpack.c.bf16 %v1672_v35, %v1671_v36 }
 0x2bd   :  { %1549 = vmatprep.subr.bf16.mxu1 %v1548_v37 }
 0x2be   :  { %1551 = vmatpush3.bf16.msra.mxu1 %v1548_v37 }
 0x2c1   :  { %1437 = vmatmul.mubr.msk.f32.vlgmr.msra.gmra.mrb[0].mxu1 %vm332_vm2, %v237_v38 }
 0x2c2   :  { %1439 = vmatprep.mubr.msk.f32.mxu1 %vm332_vm2, %v238_v40 }
 0x2c5   :  { %1440 = vmatmul.mubr.msk.f32.gmra.mrb[2].mxu1 %vm332_vm2, %v239_v41  ;;  %v275_v51 = vpop.permute.xlu0 %274 }
 0x2c6   :  { %1442 = vmatprep.mubr.msk.f32.mxu1 %vm332_vm2, %v240_v42 }
 0x2c9   :  { %1443 = vmatmul.mubr.msk.f32.gmra.mrb[4].mxu1 %vm332_vm2, %v241_v43  ;;  %v280_v50 = vpop.permute.xlu1 %279  ;;  %v285_v61 = vpop.permute.xlu0 %284 }
 0x2ca   :  { %1445 = vmatprep.mubr.msk.f32.mxu1 %vm332_vm2, %v242_v44 }
 0x2cd   :  { %1446 = vmatmul.mubr.msk.f32.gmra.mrb[6].mxu1 %vm332_vm2, %v243_v45  ;;  %v290_v58 = vpop.permute.xlu1 %289 }
 0x2ce   :  { %v255_v12 = vpop.permute.xlu0 %254 }
 0x2d1   :  { %v260_v11 = vpop.permute.xlu1 %259 }
 0x2d2   :  { %v265_v22 = vpop.permute.xlu0 %264 }
 0x2d5   :  { %v270_v18 = vpop.permute.xlu1 %269 }
 0x394   :  { %v1438_v46 = vpop.f32.mrb[0].mxu1 }
 0x395   :  { %v423_v47 = vpop.f32.mrb[1].mxu1  ;;  %v429_v13 = vadd.f32 %v1438_v46, %v260_v11 }
 0x396   :  { %v424_v15 = vadd.f32 %v423_v47, %v255_v12  ;;  %v1286_v12 = vld [vmem:[%s2358_s4 + $0x60] sm:$0xff] }
 0x398   :  { %v1441_v48 = vpop.f32.mrb[2].mxu1 }
 0x399   :  { %v433_v49 = vpop.f32.mrb[3].mxu1  ;;  %v439_v23 = vadd.f32 %v1441_v48, %v270_v18 }
 0x39a   :  { %v434_v28 = vadd.f32 %v433_v49, %v265_v22 }
 0x39c   :  { %v1444_v52 = vpop.f32.mrb[4].mxu1 }
 0x39d   :  { %v449_v54 = vadd.f32 %v1444_v52, %v280_v50  ;;  %v443_v55 = vpop.f32.mrb[5].mxu1 }
 0x39e   :  { %v444_v56 = vadd.f32 %v443_v55, %v275_v51 }
 0x39f   :  { %v1271_v57 = vmul.f32 -1.442695, %v449_v54 }
 0x3a0   :  { %v1270_v59 = vmul.f32 -1.442695, %v444_v56  ;;  %v1447_v60 = vpop.f32.mrb[6].mxu1 }
 0x3a1   :  { %1773 = vpow2.f32 %v1271_v57  ;;  %v459_v62 = vadd.f32 %v1447_v60, %v290_v58  ;;  %v453_v63 = vpop.f32.mrb[7].mxu1 }
 0x3a2   :  { %1775 = vpow2.f32 %v1270_v59  ;;  %v454_v0 = vadd.f32 %v453_v63, %v285_v61 }
 0x3a3   :  { %v1273_v1 = vmul.f32 -1.442695, %v459_v62 }
 0x3a4   :  { %v1272_v2 = vmul.f32 -1.442695, %v454_v0 }
 0x3a5   :  { %1777 = vpow2.f32 %v1273_v1 }
 0x3a6   :  { %1779 = vpow2.f32 %v1272_v2 }
 0x3ab   :  { %v1774_v3 = vpop.eup %1773 }
 0x3ac   :  { %v1776_v4 = vpop.eup %1775  ;;  %v475_v5 = vadd.f32 1.0, %v1774_v3 }
 0x3ad   :  { %v474_v6 = vadd.f32 1.0, %v1776_v4 }
 0x3ae   :  { %1781 = vrcp.f32 %v475_v5 }
 0x3af   :  { %v1778_v7 = vpop.eup %1777  ;;  %1783 = vrcp.f32 %v474_v6  ;;  %v1274_v6 = vld [vmem:[%s2357_s3 + $0x40] sm:$0xff] }
 0x3b0   :  { %v1780_v8 = vpop.eup %1779  ;;  %v477_v9 = vadd.f32 1.0, %v1778_v7  ;;  %1472 = vmatprep.mubr.msk.f32.mxu0 %vm332_vm2, %v1274_v6 }
 0x3b1   :  { %v476_v10 = vadd.f32 1.0, %v1780_v8 }
 0x3b2   :  { %1785 = vrcp.f32 %v477_v9 }
 0x3b3   :  { %1787 = vrcp.f32 %v476_v10 }
 0x3b8   :  { %v1782_v14 = vpop.eup %1781 }
 0x3b9   :  { %v1784_v16 = vpop.eup %1783  ;;  %v487_v17 = vmul.f32 %v1782_v14, %v429_v13 }
 0x3ba   :  { %v486_v20 = vmul.f32 %v1784_v16, %v424_v15 }
 0x3bb   :  { %v491_v25 = vadd.f32 %v487_v17, %v1941_v19 }
 0x3bc   :  { %v1786_v27 = vpop.eup %1785  ;;  %v490_v29 = vadd.f32 %v486_v20, %v1943_v21  ;;  %v1287_v20 = vld [vmem:[%s2358_s4 + $0x68] sm:$0xff] }
 0x3bd   :  { %v1788_v30 = vpop.eup %1787  ;;  %v2068_v31 = vmul.f32 0.70710677, %v491_v25  ;;  %v489_v32 = vmul.f32 %v1786_v27, %v439_v23  ;;  %v1288_v23 = vld [vmem:[%s2358_s4 + $0x70] sm:$0xff] }
 0x3be   :  { %v2070_v33 = vmul.f32 0.70710677, %v490_v29  ;;  %v488_v34 = vmul.f32 %v1788_v30, %v434_v28  ;;  %v1289_v30 = vld [vmem:[%s2358_s4 + $0x78] sm:$0xff] }
 0x3bf   :  { %501 = vrot.lane.b32.xlu1 %v2068_v31, %s1848_s2  ;;  %v493_v35 = vadd.f32 %v489_v32, %v1949_v24  ;;  %v1282_v32 = vld [vmem:[%s2358_s4 + $0x40] sm:$0xff] }
 0x3c0   :  { %498 = vrot.lane.b32.xlu0 %v2070_v33, %s1848_s2  ;;  %v492_v19 = vadd.f32 %v488_v34, %v1951_v26  ;;  %v1673_v45 = vpack.i.bf16 %v2068_v31, %v2070_v33 }
 0x3c1   :  { %v2078_v36 = vmul.f32 0.70710677, %v493_v35  ;;  %v1283_v35 = vld [vmem:[%s2358_s4 + $0x48] sm:$0xff] }
 0x3c2   :  { %v2080_v21 = vmul.f32 0.70710677, %v492_v19  ;;  %v1284_v19 = vld [vmem:[%s2358_s4 + $0x50] sm:$0xff] }
 0x3c3   :  { %507 = vrot.lane.b32.xlu1 %v2078_v36, %s1848_s2 }
 0x3c4   :  { %504 = vrot.lane.b32.xlu0 %v2080_v21, %s1848_s2  ;;  %v1678_v44 = vpack.i.bf16 %v2078_v36, %v2080_v21 }
 0x431   :  { %v502_v37 = vpop.permute.xlu1 %501 }
 0x432   :  { %v499_v38 = vpop.permute.xlu0 %498  ;;  %v503_v24 = vsel %vm160_vm1, %v502_v37, %v2068_v31  ;;  %v1285_v37 = vld [vmem:[%s2358_s4 + $0x58] sm:$0xff] }
 0x433   :  { %512 = vrot.lane.b32.xlu1 %v503_v24, %s1848_s2  ;;  %v500_v26 = vsel %vm160_vm1, %v499_v38, %v2070_v33 }
 0x434   :  { %510 = vrot.lane.b32.xlu0 %v500_v26, %s1848_s2 }
 0x435   :  { %v508_v40 = vpop.permute.xlu1 %507 }
 0x436   :  { %v505_v41 = vpop.permute.xlu0 %504  ;;  %v509_v42 = vsel %vm160_vm1, %v508_v40, %v2078_v36 }
 0x437   :  { %516 = vrot.lane.b32.xlu1 %v509_v42, %s1848_s2  ;;  %v506_v43 = vsel %vm160_vm1, %v505_v41, %v2080_v21 }
 0x438   :  { %514 = vrot.lane.b32.xlu0 %v506_v43, %s1848_s2 }
 0x43b   :  { %1679 = vrot.lane.b32.xlu1 %v1678_v44, %s1850_s10 }
 0x43c   :  { %1674 = vrot.lane.b32.xlu0 %v1673_v45, %s1850_s10  ;;  %v1275_v45 = vld [vmem:[%s2357_s3 + $0x48] sm:$0xff] }
 0x4a5   :  { %v513_v46 = vpop.permute.xlu1 %512 }
 0x4a6   :  { %v519_v47 = vsel %vm160_vm1, %v513_v46, %v2068_v31  ;;  %v511_v48 = vpop.permute.xlu0 %510  ;;  %v1276_v46 = vld [vmem:[%s2357_s3 + $0x50] sm:$0xff] }
 0x4a7   :  { %v527_v49 = vmul.f32 %v519_v47, %v1982_v39  ;;  %v518_v50 = vsel %vm160_vm1, %v511_v48, %v2070_v33  ;;  %v523_v54 = vmul.f32 %v519_v47, %v1997_v53  ;;  %v1277_v47 = vld [vmem:[%s2357_s3 + $0x58] sm:$0xff]  ;;  %v1278_v48 = vld [vmem:[%s2357_s3 + $0x60] sm:$0xff] }
 0x4a8   :  { %v526_v51 = vmul.f32 %v518_v50, %v1982_v39  ;;  %v522_v55 = vmul.f32 %v518_v50, %v1997_v53  ;;  %v1280_v50 = vld [vmem:[%s2357_s3 + $0x70] sm:$0xff] }
 0x4a9   :  { %v517_v52 = vpop.permute.xlu1 %516 }
 0x4aa   :  { %v521_v56 = vsel %vm160_vm1, %v517_v52, %v2078_v36  ;;  %v515_v57 = vpop.permute.xlu0 %514  ;;  %v1683_v58 = vpack.i.bf16 %v527_v49, %v526_v51  ;;  %v1693_v1 = vpack.i.bf16 %v523_v54, %v522_v55  ;;  %v1279_v49 = vld [vmem:[%s2357_s3 + $0x68] sm:$0xff]  ;;  %v1281_v51 = vld [vmem:[%s2357_s3 + $0x78] sm:$0xff] }
 0x4ab   :  { %v529_v59 = vmul.f32 %v521_v56, %v1982_v39  ;;  %v520_v60 = vsel %vm160_vm1, %v515_v57, %v2080_v21  ;;  %v525_v62 = vmul.f32 %v521_v56, %v1997_v53 }
 0x4ac   :  { %v528_v61 = vmul.f32 %v520_v60, %v1982_v39  ;;  %1684 = vrot.lane.b32.xlu0 %v1683_v58, %s1851_s5  ;;  %v524_v63 = vmul.f32 %v520_v60, %v1997_v53 }
 0x4ad   :  { %v1680_v3 = vpop.permute.xlu1 %1679 }
 0x4ae   :  { %v1675_v0 = vpop.permute.xlu0 %1674  ;;  %v1688_v2 = vpack.i.bf16 %v529_v59, %v528_v61  ;;  %v1698_v4 = vpack.i.bf16 %v525_v62, %v524_v63 }
 0x4b0   :  { %1694 = vrot.lane.b32.xlu0 %v1693_v1, %s1852_s11  ;;  %1689 = vrot.lane.b32.xlu1 %v1688_v2, %s1851_s5 }
 0x4b4   :  { %1699 = vrot.lane.b32.xlu1 %v1698_v4, %s1852_s11  ;;  %1704 = vrot.lane.b32.xlu0 %v1675_v0, %s1852_s11 }
 0x4b8   :  { %1709 = vrot.lane.b32.xlu1 %v1680_v3, %s1852_s11 }
 0x51e   :  { %v1685_v5 = vpop.permute.xlu0 %1684 }
 0x51f   :  { %1714 = vrot.lane.b32.xlu0 %v1685_v5, %s1852_s11 }
 0x522   :  { %v1690_v7 = vpop.permute.xlu1 %1689  ;;  %v1695_v8 = vpop.permute.xlu0 %1694 }
 0x523   :  { %v1697_v9 = vunpack.i.h.bf16 %v1695_v8  ;;  %v1696_v10 = vunpack.i.l.bf16 %v1695_v8  ;;  %1719 = vrot.lane.b32.xlu1 %v1690_v7, %s1852_s11  ;;  %594 = vperm.xlu0 %1621, %v1286_v12  }
 0x525   :  { %v1552_v11 = vpack.c.bf16 %v1697_v9, %v1696_v10 }
 0x526   :  { %v1700_v13 = vpop.permute.xlu1 %1699  ;;  %v1705_v14 = vpop.permute.xlu0 %1704 }
 0x527   :  { %v1702_v15 = vunpack.i.h.bf16 %v1700_v13  ;;  %v1701_v16 = vunpack.i.l.bf16 %v1700_v13  ;;  %v1707_v17 = vunpack.i.h.bf16 %v1705_v14  ;;  %v1706_v18 = vunpack.i.l.bf16 %v1705_v14  ;;  %1553 = vmatprep.subr.bf16.mxu0 %v1552_v11  ;;  %599 = vperm.xlu1 %1622, %v1287_v20  }
 0x528   :  { %1555 = vmatpush3.bf16.msra.mxu0 %v1552_v11  ;;  %604 = vperm.xlu0 %1621, %v1288_v23  }
 0x529   :  { %v1556_v22 = vpack.c.bf16 %v1702_v15, %v1701_v16  ;;  %v1560_v27 = vpack.c.bf16 %v1707_v17, %v1706_v18 }
 0x52a   :  { %v1710_v25 = vpop.permute.xlu1 %1709 }
 0x52b   :  { %v1712_v28 = vunpack.i.h.bf16 %v1710_v25  ;;  %v1711_v29 = vunpack.i.l.bf16 %v1710_v25  ;;  %1557 = vmatprep.subr.bf16.mxu0 %v1556_v22  ;;  %609 = vperm.xlu1 %1622, %v1289_v30  }
 0x52c   :  { %1559 = vmatpush3.bf16.msra.mxu0 %v1556_v22  ;;  %574 = vperm.xlu0 %1621, %v1282_v32  }
 0x52d   :  { %1561 = vmatprep.subr.bf16.mxu0 %v1560_v27  ;;  %v1564_v34 = vpack.c.bf16 %v1712_v28, %v1711_v29 }
 0x52f   :  { %579 = vperm.xlu1 %1622, %v1283_v35  }
 0x530   :  { %1563 = vmatpush3.bf16.msra.mxu0 %v1560_v27  ;;  %584 = vperm.xlu0 %1621, %v1284_v19  }
 0x531   :  { %1565 = vmatprep.subr.bf16.mxu0 %v1564_v34 }
 0x533   :  { %589 = vperm.xlu1 %1622, %v1285_v37  }
 0x534   :  { %1567 = vmatpush3.bf16.msra.mxu0 %v1564_v34 }
 0x591   :  { %v1715_v38 = vpop.permute.xlu0 %1714 }
 0x592   :  { %v1717_v24 = vunpack.i.h.bf16 %v1715_v38  ;;  %v1716_v26 = vunpack.i.l.bf16 %v1715_v38 }
 0x594   :  { %v1568_v40 = vpack.c.bf16 %v1717_v24, %v1716_v26 }
 0x595   :  { %v1720_v41 = vpop.permute.xlu1 %1719 }
 0x596   :  { %v1722_v42 = vunpack.i.h.bf16 %v1720_v41  ;;  %v1721_v43 = vunpack.i.l.bf16 %v1720_v41  ;;  %1569 = vmatprep.subr.bf16.mxu0 %v1568_v40 }
 0x597   :  { %1571 = vmatpush3.bf16.msra.mxu0 %v1568_v40 }
 0x598   :  { %v1572_v44 = vpack.c.bf16 %v1722_v42, %v1721_v43 }
 0x59a   :  { %1573 = vmatprep.subr.bf16.mxu0 %v1572_v44 }
 0x59b   :  { %1575 = vmatpush3.bf16.msra.mxu0 %v1572_v44 }
 0x59e   :  { %1473 = vmatmul.mubr.msk.f32.vlgmr.msra.gmra.mrb[4].mxu0 %vm332_vm2, %v1275_v45 }
 0x59f   :  { %1475 = vmatprep.mubr.msk.f32.mxu0 %vm332_vm2, %v1276_v46 }
 0x5a2   :  { %1476 = vmatmul.mubr.msk.f32.gmra.mrb[6].mxu0 %vm332_vm2, %v1277_v47  ;;  %v595_v58 = vpop.permute.xlu0 %594 }
 0x5a3   :  { %1478 = vmatprep.mubr.msk.f32.mxu0 %vm332_vm2, %v1278_v48 }
 0x5a6   :  { %1479 = vmatmul.mubr.msk.f32.gmra.mrb[8].mxu0 %vm332_vm2, %v1279_v49  ;;  %v600_v57 = vpop.permute.xlu1 %599 }
 0x5a7   :  { %1481 = vmatprep.mubr.msk.f32.mxu0 %vm332_vm2, %v1280_v50  ;;  %v605_v3 = vpop.permute.xlu0 %604 }
 0x5aa   :  { %1482 = vmatmul.mubr.msk.f32.gmra.mrb[10].mxu0 %vm332_vm2, %v1281_v51  ;;  %v610_v0 = vpop.permute.xlu1 %609 }
 0x5ab   :  { %v575_v18 = vpop.permute.xlu0 %574 }
 0x5ae   :  { %v580_v17 = vpop.permute.xlu1 %579 }
 0x5af   :  { %v585_v30 = vpop.permute.xlu0 %584 }
 0x5b2   :  { %v590_v28 = vpop.permute.xlu1 %589 }
 0x671   :  { %v1474_v52 = vpop.f32.mrb[4].mxu0 }
 0x672   :  { %v742_v54 = vpop.f32.mrb[5].mxu0  ;;  %v748_v20 = vadd.f32 %v1474_v52, %v580_v17  ;;  %v1314_v17 = vld [vmem:[%s2358_s4 + $0xa0] sm:$0xff] }
 0x673   :  { %v743_v23 = vadd.f32 %v742_v54, %v575_v18 }
 0x675   :  { %v1477_v55 = vpop.f32.mrb[6].mxu0 }
 0x676   :  { %v752_v56 = vpop.f32.mrb[7].mxu0  ;;  %v758_v32 = vadd.f32 %v1477_v55, %v590_v28  ;;  %v1315_v28 = vld [vmem:[%s2358_s4 + $0xa8] sm:$0xff] }
 0x677   :  { %v753_v19 = vadd.f32 %v752_v56, %v585_v30  ;;  %v1316_v30 = vld [vmem:[%s2358_s4 + $0xb0] sm:$0xff] }
 0x679   :  { %v1480_v59 = vpop.f32.mrb[8].mxu0 }
 0x67a   :  { %v768_v60 = vadd.f32 %v1480_v59, %v600_v57  ;;  %v762_v61 = vpop.f32.mrb[9].mxu0 }
 0x67b   :  { %v763_v62 = vadd.f32 %v762_v61, %v595_v58 }
 0x67c   :  { %v1299_v63 = vmul.f32 -1.442695, %v768_v60 }
 0x67d   :  { %v1298_v1 = vmul.f32 -1.442695, %v763_v62  ;;  %v1483_v2 = vpop.f32.mrb[10].mxu0 }
 0x67e   :  { %1789 = vpow2.f32 %v1299_v63  ;;  %v778_v4 = vadd.f32 %v1483_v2, %v610_v0  ;;  %v772_v5 = vpop.f32.mrb[11].mxu0 }
 0x67f   :  { %1791 = vpow2.f32 %v1298_v1  ;;  %v773_v6 = vadd.f32 %v772_v5, %v605_v3 }
 0x680   :  { %v1301_v7 = vmul.f32 -1.442695, %v778_v4 }
 0x681   :  { %v1300_v8 = vmul.f32 -1.442695, %v773_v6 }
 0x682   :  { %1793 = vpow2.f32 %v1301_v7 }
 0x683   :  { %1795 = vpow2.f32 %v1300_v8 }
 0x688   :  { %v1790_v9 = vpop.eup %1789 }
 0x689   :  { %v1792_v10 = vpop.eup %1791  ;;  %v794_v11 = vadd.f32 1.0, %v1790_v9 }
 0x68a   :  { %v793_v12 = vadd.f32 1.0, %v1792_v10 }
 0x68b   :  { %1797 = vrcp.f32 %v794_v11  ;;  %v1304_v11 = vld [vmem:[%s2357_s3 + $0x90] sm:$0xff] }
 0x68c   :  { %v1794_v13 = vpop.eup %1793  ;;  %1799 = vrcp.f32 %v793_v12  ;;  %1511 = vmatprep.mubr.msk.f32.mxu1 %vm332_vm2, %v1304_v11 }
 0x68d   :  { %v1796_v14 = vpop.eup %1795  ;;  %v796_v15 = vadd.f32 1.0, %v1794_v13 }
 0x68e   :  { %v795_v16 = vadd.f32 1.0, %v1796_v14 }
 0x68f   :  { %1801 = vrcp.f32 %v796_v15 }
 0x690   :  { %1803 = vrcp.f32 %v795_v16 }
 0x695   :  { %v1798_v22 = vpop.eup %1797 }
 0x696   :  { %v1800_v25 = vpop.eup %1799  ;;  %v806_v27 = vmul.f32 %v1798_v22, %v748_v20 }
 0x697   :  { %v805_v29 = vmul.f32 %v1800_v25, %v743_v23 }
 0x698   :  { %v810_v34 = vadd.f32 %v806_v27, %v2068_v31 }
 0x699   :  { %v1802_v35 = vpop.eup %1801  ;;  %v809_v37 = vadd.f32 %v805_v29, %v2070_v33 }
 0x69a   :  { %v1804_v38 = vpop.eup %1803  ;;  %v2186_v24 = vmul.f32 0.70710677, %v810_v34  ;;  %v808_v26 = vmul.f32 %v1802_v35, %v758_v32 }
 0x69b   :  { %v2188_v40 = vmul.f32 0.70710677, %v809_v37  ;;  %v807_v41 = vmul.f32 %v1804_v38, %v753_v19  ;;  %v1317_v37 = vld [vmem:[%s2358_s4 + $0xb8] sm:$0xff]  ;;  %v1310_v38 = vld [vmem:[%s2358_s4 + $0x80] sm:$0xff] }
 0x69c   :  { %820 = vrot.lane.b32.xlu1 %v2186_v24, %s1848_s2  ;;  %v812_v42 = vadd.f32 %v808_v26, %v2078_v36 }
 0x69d   :  { %817 = vrot.lane.b32.xlu0 %v2188_v40, %s1848_s2  ;;  %v811_v31 = vadd.f32 %v807_v41, %v2080_v21  ;;  %v1723_v51 = vpack.i.bf16 %v2186_v24, %v2188_v40  ;;  %v1311_v41 = vld [vmem:[%s2358_s4 + $0x88] sm:$0xff] }
 0x69e   :  { %v2196_v43 = vmul.f32 0.70710677, %v812_v42  ;;  %v1312_v42 = vld [vmem:[%s2358_s4 + $0x90] sm:$0xff] }
 0x69f   :  { %v2198_v33 = vmul.f32 0.70710677, %v811_v31  ;;  %v1313_v31 = vld [vmem:[%s2358_s4 + $0x98] sm:$0xff] }
 0x6a0   :  { %826 = vrot.lane.b32.xlu1 %v2196_v43, %s1848_s2 }
 0x6a1   :  { %823 = vrot.lane.b32.xlu0 %v2198_v33, %s1848_s2  ;;  %v1728_v50 = vpack.i.bf16 %v2196_v43, %v2198_v33 }
 0x70e   :  { %v821_v44 = vpop.permute.xlu1 %820 }
 0x70f   :  { %v818_v45 = vpop.permute.xlu0 %817  ;;  %v822_v36 = vsel %vm160_vm1, %v821_v44, %v2186_v24  ;;  %v1179_v44 = vld [vmem:[%s2360_s6] sm:$0xff] }
 0x710   :  { %831 = vrot.lane.b32.xlu1 %v822_v36, %s1848_s2  ;;  %v819_v21 = vsel %vm160_vm1, %v818_v45, %v2188_v40  ;;  %v1180_v45 = vld [vmem:[%s2360_s6 + $0x8] sm:$0xff]  ;;  %v1181_v36 = vld [vmem:[%s2360_s6 + $0x10] sm:$0xff] }
 0x711   :  { %829 = vrot.lane.b32.xlu0 %v819_v21, %s1848_s2  ;;  %v1182_v21 = vld [vmem:[%s2360_s6 + $0x18] sm:$0xff] }
 0x712   :  { %v827_v46 = vpop.permute.xlu1 %826 }
 0x713   :  { %v824_v47 = vpop.permute.xlu0 %823  ;;  %v828_v48 = vsel %vm160_vm1, %v827_v46, %v2196_v43  ;;  %v1207_v46 = vld [vmem:[%s2361_s7] sm:$0xff] }
 0x714   :  { %835 = vrot.lane.b32.xlu1 %v828_v48, %s1848_s2  ;;  %v825_v49 = vsel %vm160_vm1, %v824_v47, %v2198_v33  ;;  %v1208_v47 = vld [vmem:[%s2361_s7 + $0x8] sm:$0xff]  ;;  %v1209_v48 = vld [vmem:[%s2361_s7 + $0x10] sm:$0xff] }
 0x715   :  { %833 = vrot.lane.b32.xlu0 %v825_v49, %s1848_s2  ;;  %v1210_v49 = vld [vmem:[%s2361_s7 + $0x18] sm:$0xff] }
 0x718   :  { %1729 = vrot.lane.b32.xlu1 %v1728_v50, %s1850_s10 }
 0x719   :  { %1724 = vrot.lane.b32.xlu0 %v1723_v51, %s1850_s10 }
 0x782   :  { %v832_v52 = vpop.permute.xlu1 %831 }
 0x783   :  { %v838_v54 = vsel %vm160_vm1, %v832_v52, %v2186_v24  ;;  %v830_v55 = vpop.permute.xlu0 %829 }
 0x784   :  { %v846_v56 = vmul.f32 %v838_v54, %v1982_v39  ;;  %v837_v57 = vsel %vm160_vm1, %v830_v55, %v2188_v40  ;;  %v842_v60 = vmul.f32 %v838_v54, %v1997_v53 }
 0x785   :  { %v845_v58 = vmul.f32 %v837_v57, %v1982_v39  ;;  %v841_v61 = vmul.f32 %v837_v57, %v1997_v53 }
 0x786   :  { %v836_v59 = vpop.permute.xlu1 %835 }
 0x787   :  { %v840_v62 = vsel %vm160_vm1, %v836_v59, %v2196_v43  ;;  %v834_v63 = vpop.permute.xlu0 %833  ;;  %v1733_v0 = vpack.i.bf16 %v846_v56, %v845_v58  ;;  %v1743_v7 = vpack.i.bf16 %v842_v60, %v841_v61  ;;  %v1303_v59 = vld [vmem:[%s2357_s3 + $0x88] sm:$0xff]  ;;  %v1305_v60 = vld [vmem:[%s2357_s3 + $0x98] sm:$0xff]  ;;  %v1306_v61 = vld [vmem:[%s2357_s3 + $0xa0] sm:$0xff] }
 0x788   :  { %v848_v1 = vmul.f32 %v840_v62, %v1982_v39  ;;  %v839_v2 = vsel %vm160_vm1, %v834_v63, %v2198_v33  ;;  %v844_v4 = vmul.f32 %v840_v62, %v1997_v53  ;;  %v1307_v62 = vld [vmem:[%s2357_s3 + $0xa8] sm:$0xff]  ;;  %v1308_v63 = vld [vmem:[%s2357_s3 + $0xb0] sm:$0xff] }
 0x789   :  { %v847_v3 = vmul.f32 %v839_v2, %v1982_v39  ;;  %1734 = vrot.lane.b32.xlu0 %v1733_v0, %s1851_s5  ;;  %v843_v5 = vmul.f32 %v839_v2, %v1997_v53  ;;  %v1302_v53 = vld [vmem:[%s2357_s3 + $0x80] sm:$0xff]  ;;  %v1309_v0 = vld [vmem:[%s2357_s3 + $0xb8] sm:$0xff]  ;;  %s1853_s3 = smov [#allocation2]  }
 0x78a   :  { %v1730_v9 = vpop.permute.xlu1 %1729  ;;  %1508 = vmatprep.mubr.msk.f32.mxu0 %vm332_vm2, %v1302_v53  ;;  %s1244_s24 = sshll.u32 %s1853_s3, 4  ;;  %s1245_s24 = int_to_ptr.vmem [resolvable:$true] %s1244_s24 }
 0x78b   :  { %v1725_v6 = vpop.permute.xlu0 %1724  ;;  %v1738_v8 = vpack.i.bf16 %v848_v1, %v847_v3  ;;  %v1748_v10 = vpack.i.bf16 %v844_v4, %v843_v5  ;;  %s1823_s25 = scalar_lea.vmem %s1245_s24, 512  ;;  %p1828_p1 = scmp.lt.s32.totalorder %s1245_s24, %s1245_s24 }
 0x78c   :  { %p1824_p0 = scmp.ne.s32.totalorder %s1245_s24, %s1823_s25  ;;  %p1829_p2 = scmp.lt.s32.totalorder %s1823_s25, %s1823_s25 }
 0x78d   :  { %1744 = vrot.lane.b32.xlu0 %v1743_v7, %s1852_s11  ;;  %1739 = vrot.lane.b32.xlu1 %v1738_v8, %s1851_s5 }
 0x78e   :  { %p1830_p3 = por %p1829_p2, %p1828_p1 }
 0x790   :  { %p1831_p4 = pnand %p1830_p3, %p1824_p0 }
 0x791   :  { %1749 = vrot.lane.b32.xlu1 %v1748_v10, %s1852_s11  ;;  %1754 = vrot.lane.b32.xlu0 %v1725_v6, %s1852_s11 }
 0x795   :  { %1759 = vrot.lane.b32.xlu1 %v1730_v9, %s1852_s11 }
 0x7fb   :  { %v1735_v39 = vpop.permute.xlu0 %1734 }
 0x7fc   :  { %1764 = vrot.lane.b32.xlu0 %v1735_v39, %s1852_s11 }
 0x7ff   :  { %v1740_v12 = vpop.permute.xlu1 %1739  ;;  %v1745_v13 = vpop.permute.xlu0 %1744 }
 0x800   :  { %v1747_v14 = vunpack.i.h.bf16 %v1745_v13  ;;  %v1746_v15 = vunpack.i.l.bf16 %v1745_v13  ;;  %1769 = vrot.lane.b32.xlu1 %v1740_v12, %s1852_s11  ;;  %913 = vperm.xlu0 %1621, %v1314_v17  }
 0x802   :  { %v1576_v16 = vpack.c.bf16 %v1747_v14, %v1746_v15 }
 0x803   :  { %v1750_v18 = vpop.permute.xlu1 %1749  ;;  %v1755_v20 = vpop.permute.xlu0 %1754 }
 0x804   :  { %v1752_v22 = vunpack.i.h.bf16 %v1750_v18  ;;  %v1751_v23 = vunpack.i.l.bf16 %v1750_v18  ;;  %1577 = vmatprep.subr.bf16.mxu0 %v1576_v16  ;;  %v1757_v25 = vunpack.i.h.bf16 %v1755_v20  ;;  %v1756_v27 = vunpack.i.l.bf16 %v1755_v20  ;;  %1600 = vmatprep.subr.bf16.mxu1 %v1576_v16 }
 0x805   :  { %1579 = vmatpush3.bf16.msra.mxu0 %v1576_v16  ;;  %1606 = vmatpush3.bf16.msra.mxu1 %v1576_v16 }
 0x806   :  { %v1580_v29 = vpack.c.bf16 %v1752_v22, %v1751_v23  ;;  %918 = vperm.xlu1 %1622, %v1315_v28   ;;  %v1584_v34 = vpack.c.bf16 %v1757_v25, %v1756_v27  ;;  %923 = vperm.xlu0 %1621, %v1316_v30  }
 0x807   :  { %v1760_v32 = vpop.permute.xlu1 %1759 }
 0x808   :  { %1581 = vmatprep.subr.bf16.mxu0 %v1580_v29  ;;  %v1762_v35 = vunpack.i.h.bf16 %v1760_v32  ;;  %v1761_v19 = vunpack.i.l.bf16 %v1760_v32  ;;  %1601 = vmatprep.subr.bf16.mxu1 %v1580_v29 }
 0x809   :  { %1583 = vmatpush3.bf16.msra.mxu0 %v1580_v29  ;;  %1607 = vmatpush3.bf16.msra.mxu1 %v1580_v29 }
 0x80a   :  { %1585 = vmatprep.subr.bf16.mxu0 %v1584_v34  ;;  %1602 = vmatprep.subr.bf16.mxu1 %v1584_v34  ;;  %v1588_v26 = vpack.c.bf16 %v1762_v35, %v1761_v19 }
 0x80b   :  { %928 = vperm.xlu1 %1622, %v1317_v37   ;;  %893 = vperm.xlu0 %1621, %v1310_v38  }
 0x80d   :  { %1587 = vmatpush3.bf16.msra.mxu0 %v1584_v34  ;;  %1608 = vmatpush3.bf16.msra.mxu1 %v1584_v34 }
 0x80e   :  { %1589 = vmatprep.subr.bf16.mxu0 %v1588_v26  ;;  %1603 = vmatprep.subr.bf16.mxu1 %v1588_v26 }
 0x80f   :  { %898 = vperm.xlu1 %1622, %v1311_v41   ;;  %903 = vperm.xlu0 %1621, %v1312_v42  }
 0x811   :  { %1591 = vmatpush3.bf16.msra.mxu0 %v1588_v26  ;;  %1609 = vmatpush3.bf16.msra.mxu1 %v1588_v26 }
 0x813   :  { %908 = vperm.xlu1 %1622, %v1313_v31   ;;  %1185 = vperm.xlu0 %1621, %v1179_v44  }
 0x817   :  { %1190 = vperm.xlu1 %1622, %v1180_v45   ;;  %1195 = vperm.xlu0 %1621, %v1181_v36  }
 0x81b   :  { %1200 = vperm.xlu1 %1622, %v1182_v21   ;;  %1213 = vperm.xlu0 %1621, %v1207_v46  }
 0x81f   :  { %1218 = vperm.xlu1 %1622, %v1208_v47   ;;  %1223 = vperm.xlu0 %1621, %v1209_v48  }
 0x823   :  { %1228 = vperm.xlu1 %1622, %v1210_v49  }
 0x86e   :  { %v1765_v50 = vpop.permute.xlu0 %1764 }
 0x86f   :  { %v1767_v51 = vunpack.i.h.bf16 %v1765_v50  ;;  %v1766_v52 = vunpack.i.l.bf16 %v1765_v50 }
 0x871   :  { %v1592_v54 = vpack.c.bf16 %v1767_v51, %v1766_v52 }
 0x872   :  { %v1770_v55 = vpop.permute.xlu1 %1769 }
 0x873   :  { %v1772_v56 = vunpack.i.h.bf16 %v1770_v55  ;;  %v1771_v57 = vunpack.i.l.bf16 %v1770_v55  ;;  %1593 = vmatprep.subr.bf16.mxu0 %v1592_v54  ;;  %1604 = vmatprep.subr.bf16.mxu1 %v1592_v54 }
 0x874   :  { %1595 = vmatpush3.bf16.msra.mxu0 %v1592_v54  ;;  %1610 = vmatpush3.bf16.msra.mxu1 %v1592_v54 }
 0x875   :  { %v1596_v58 = vpack.c.bf16 %v1772_v56, %v1771_v57 }
 0x877   :  { %1597 = vmatprep.subr.bf16.mxu0 %v1596_v58  ;;  %1605 = vmatprep.subr.bf16.mxu1 %v1596_v58 }
 0x878   :  { %1599 = vmatpush3.bf16.msra.mxu0 %v1596_v58  ;;  %1611 = vmatpush3.bf16.msra.mxu1 %v1596_v58 }
 0x87b   :  { %1509 = vmatmul.mubr.msk.f32.vlgmr.msra.gmra.mrb[12].mxu0 %vm332_vm2, %v1303_v59  ;;  %1512 = vmatmul.mubr.msk.f32.vlgmr.msra.gmra.mrb[8].mxu1 %vm332_vm2, %v1305_v60 }
 0x87c   :  { %1514 = vmatprep.mubr.msk.f32.mxu1 %vm332_vm2, %v1306_v61 }
 0x87f   :  { %1515 = vmatmul.mubr.msk.f32.gmra.mrb[10].mxu1 %vm332_vm2, %v1307_v62  ;;  %v914_v6 = vpop.permute.xlu0 %913 }
 0x880   :  { %1517 = vmatprep.mubr.msk.f32.mxu1 %vm332_vm2, %v1308_v63 }
 0x883   :  { %1518 = vmatmul.mubr.msk.f32.gmra.mrb[12].mxu1 %vm332_vm2, %v1309_v0 }
 0x885   :  { %v919_v5 = vpop.permute.xlu1 %918  ;;  %v924_v13 = vpop.permute.xlu0 %923 }
 0x88a   :  { %v929_v53 = vpop.permute.xlu1 %928  ;;  %v894_v34 = vpop.permute.xlu0 %893 }
 0x88e   :  { %v899_v32 = vpop.permute.xlu1 %898  ;;  %v904_v31 = vpop.permute.xlu0 %903 }
 0x892   :  { %v909_v41 = vpop.permute.xlu1 %908 }
 0x94e   :  { %v1510_v1 = vpop.f32.mrb[12].mxu0  ;;  %v1513_v2 = vpop.f32.mrb[8].mxu1 }
 0x94f   :  { %v1061_v3 = vpop.f32.mrb[13].mxu0  ;;  %v1071_v4 = vpop.f32.mrb[9].mxu1  ;;  %v1067_v35 = vadd.f32 %v1510_v1, %v899_v32  ;;  %v1077_v44 = vadd.f32 %v1513_v2, %v909_v41 }
 0x950   :  { %v1062_v37 = vadd.f32 %v1061_v3, %v894_v34  ;;  %v1072_v21 = vadd.f32 %v1071_v4, %v904_v31 }
 0x952   :  { %v1516_v7 = vpop.f32.mrb[10].mxu1 }
 0x953   :  { %v1087_v8 = vadd.f32 %v1516_v7, %v919_v5  ;;  %v1081_v9 = vpop.f32.mrb[11].mxu1 }
 0x954   :  { %v1082_v10 = vadd.f32 %v1081_v9, %v914_v6 }
 0x955   :  { %v1327_v39 = vmul.f32 -1.442695, %v1087_v8 }
 0x956   :  { %v1326_v11 = vmul.f32 -1.442695, %v1082_v10  ;;  %v1519_v12 = vpop.f32.mrb[12].mxu1 }
 0x957   :  { %1805 = vpow2.f32 %v1327_v39  ;;  %v1097_v14 = vadd.f32 %v1519_v12, %v929_v53  ;;  %v1091_v15 = vpop.f32.mrb[13].mxu1 }
 0x958   :  { %1807 = vpow2.f32 %v1326_v11  ;;  %v1092_v16 = vadd.f32 %v1091_v15, %v924_v13 }
 0x959   :  { %v1329_v17 = vmul.f32 -1.442695, %v1097_v14 }
 0x95a   :  { %v1328_v18 = vmul.f32 -1.442695, %v1092_v16 }
 0x95b   :  { %1809 = vpow2.f32 %v1329_v17 }
 0x95c   :  { %1811 = vpow2.f32 %v1328_v18 }
 0x961   :  { %v1806_v20 = vpop.eup %1805 }
 0x962   :  { %v1808_v22 = vpop.eup %1807  ;;  %v1113_v23 = vadd.f32 1.0, %v1806_v20 }
 0x963   :  { %v1112_v25 = vadd.f32 1.0, %v1808_v22 }
 0x964   :  { %1813 = vrcp.f32 %v1113_v23 }
 0x965   :  { %v1810_v27 = vpop.eup %1809  ;;  %1815 = vrcp.f32 %v1112_v25  ;;  %v1186_v25 = vpop.permute.xlu0 %1185 }
 0x966   :  { %v1812_v28 = vpop.eup %1811  ;;  %v1115_v29 = vadd.f32 1.0, %v1810_v27  ;;  %v1191_v27 = vpop.permute.xlu1 %1190 }
 0x967   :  { %v1114_v30 = vadd.f32 1.0, %v1812_v28 }
 0x968   :  { %1817 = vrcp.f32 %v1115_v29 }
 0x969   :  { %1819 = vrcp.f32 %v1114_v30  ;;  %v1196_v30 = vpop.permute.xlu0 %1195 }
 0x96a   :  { %v1201_v32 = vpop.permute.xlu1 %1200 }
 0x96d   :  { %v1214_v34 = vpop.permute.xlu0 %1213 }
 0x96e   :  { %v1814_v19 = vpop.eup %1813 }
 0x96f   :  { %v1816_v38 = vpop.eup %1815  ;;  %v1125_v26 = vmul.f32 %v1814_v19, %v1067_v35  ;;  %v1219_v35 = vpop.permute.xlu1 %1218 }
 0x970   :  { %v1124_v42 = vmul.f32 %v1816_v38, %v1062_v37 }
 0x971   :  { %v1129_v45 = vadd.f32 %v1125_v26, %v2186_v24 }
 0x972   :  { %v1818_v36 = vpop.eup %1817  ;;  %v1128_v46 = vadd.f32 %v1124_v42, %v2188_v40 }
 0x973   :  { %v1820_v47 = vpop.eup %1819  ;;  %v1133_v48 = vmul.f32 0.70710677, %v1129_v45  ;;  %v1127_v49 = vmul.f32 %v1818_v36, %v1077_v44  ;;  %v1224_v36 = vpop.permute.xlu0 %1223 }
 0x974   :  { %v1132_v50 = vmul.f32 0.70710677, %v1128_v46  ;;  %v1126_v51 = vmul.f32 %v1820_v47, %v1072_v21  ;;  %v1229_v21 = vpop.permute.xlu1 %1228 }
 0x975   :  { %v1137_v52 = vsel %vm62_vm0, %v1133_v48, 0.0  ;;  %v1131_v54 = vadd.f32 %v1127_v49, %v2196_v43 }
 0x976   :  { %v1136_v55 = vsel %vm62_vm0, %v1132_v50, 0.0  ;;  %v1130_v56 = vadd.f32 %v1126_v51, %v2198_v33 }
 0x977   :  { %v1138_v57 = vadd.f32 %v1137_v52, %v1136_v55  ;;  %v1135_v58 = vmul.f32 0.70710677, %v1131_v54 }
 0x978   :  { %v1134_v24 = vmul.f32 0.70710677, %v1130_v56 }
 0x979   :  { %v1141_v40 = vsel %vm62_vm0, %v1135_v58, 0.0 }
 0x97a   :  { %v1139_v59 = vsel %vm62_vm0, %v1134_v24, 0.0 }
 0x97b   :  { %v1140_v60 = vadd.f32 %v1139_v59, %v1138_v57 }
 0x97d   :  { %v1142_v61 = vadd.f32 %v1141_v40, %v1140_v60 }
 0x97f   :  { %v1143_v62 = vrot.slane %v1142_v61, 4 }
 0x981   :  { %v1144_v63 = vadd.f32 %v1143_v62, %v1142_v61 }
 0x983   :  { %v1145_v0 = vrot.slane %v1144_v63, 2 }
 0x985   :  { %v1146_v1 = vadd.f32 %v1145_v0, %v1144_v63 }
 0x987   :  { %v1147_v2 = vrot.slane %v1146_v1, 1 }
 0x989   :  { %v1148_v3 = vadd.f32 %v1147_v2, %v1146_v1 }
 0x98b   :  { %v1150_v43 = vmul.f32 0.03125, %v1148_v3 }
 0x98d   :  { %v1153_v4 = vsub.f32 %v1134_v24, %v1150_v43  ;;  %v1151_v5 = vsub.f32 %v1132_v50, %v1150_v43  ;;  %v1152_v6 = vsub.f32 %v1133_v48, %v1150_v43  ;;  %v1154_v33 = vsub.f32 %v1135_v58, %v1150_v43 }
 0x98f   :  { %v1157_v7 = vmul.f32 %v1153_v4, %v1153_v4  ;;  %v1155_v8 = vmul.f32 %v1151_v5, %v1151_v5  ;;  %v1156_v9 = vmul.f32 %v1152_v6, %v1152_v6  ;;  %v1158_v10 = vmul.f32 %v1154_v33, %v1154_v33 }
 0x991   :  { %v1159_v39 = vsel %vm62_vm0, %v1155_v8, 0.0  ;;  %v1160_v53 = vsel %vm62_vm0, %v1156_v9, 0.0  ;;  %v1162_v12 = vsel %vm62_vm0, %v1157_v7, 0.0  ;;  %v1164_v14 = vsel %vm62_vm0, %v1158_v10, 0.0 }
 0x992   :  { %v1161_v11 = vadd.f32 %v1160_v53, %v1159_v39 }
 0x994   :  { %v1163_v13 = vadd.f32 %v1162_v12, %v1161_v11 }
 0x996   :  { %v1165_v15 = vadd.f32 %v1164_v14, %v1163_v13 }
 0x998   :  { %v1166_v16 = vrot.slane %v1165_v15, 4 }
 0x99a   :  { %v1167_v17 = vadd.f32 %v1166_v16, %v1165_v15 }
 0x99c   :  { %v1168_v18 = vrot.slane %v1167_v17, 2 }
 0x99e   :  { %v1169_v20 = vadd.f32 %v1168_v18, %v1167_v17 }
 0x9a0   :  { %v1170_v22 = vrot.slane %v1169_v20, 1 }
 0x9a2   :  { %v1171_v23 = vadd.f32 %v1170_v22, %v1169_v20 }
 0x9a4   :  { %v1172_v28 = vmul.f32 0.03125, %v1171_v23 }
 0x9a6   :  { %v1173_v29 = vadd.f32 1e-05, %v1172_v28 }
 0x9a8   :  { %1821 = vrsqrt.f32 %v1173_v29 }
 0x9b2   :  { %v1822_v19 = vpop.eup %1821 }
 0x9b3   :  { %v1175_v37 = vmul.f32 %v1822_v19, %v1151_v5  ;;  %v1176_v38 = vmul.f32 %v1822_v19, %v1152_v6  ;;  %v1177_v26 = vmul.f32 %v1822_v19, %v1153_v4  ;;  %v1178_v41 = vmul.f32 %v1822_v19, %v1154_v33 }
 0x9b5   :  { %v1203_v42 = vmul.f32 %v1186_v25, %v1175_v37  ;;  %v1204_v31 = vmul.f32 %v1191_v27, %v1176_v38  ;;  %v1205_v44 = vmul.f32 %v1196_v30, %v1177_v26  ;;  %v1206_v45 = vmul.f32 %v1201_v32, %v1178_v41 }
 0x9b7   :  { %v1231_v46 = vadd.f32 %v1214_v34, %v1203_v42  ;;  %v1232_v47 = vadd.f32 %v1219_v35, %v1204_v31  ;;  %v1233_v48 = vadd.f32 %v1224_v36, %v1205_v44  ;;  %v1234_v49 = vadd.f32 %v1229_v21, %v1206_v45 }
 0x9b9   :  { %1235 = vst.msk [vmem:[#allocation2] sm:$0xff] %vm62_vm0, %v1231_v46  ;;  %1236 = vst.msk [vmem:[#allocation2 + $0x8] sm:$0xff] %vm62_vm0, %v1232_v47 }
 0x9ba   :  { %1237 = vst.msk [vmem:[#allocation2 + $0x10] sm:$0xff] %vm62_vm0, %v1233_v48  ;;  %1238 = vst.msk [vmem:[#allocation2 + $0x18] sm:$0xff] %vm62_vm0, %v1234_v49 }
 0x9bb   :  { %1834 = shalt.err (!%p1831_p4)
}
 0x9bc   :  { %s1835_s1 = scalar_lea.hbm %s2362_s8, 512 }
 0x9bd   :  { %p1836_p5 = scmp.ne.s32.totalorder %s2362_s8, %s1835_s1  ;;  %p1839_p6 = scmp.lt.u32.totalorder %s1835_s1, %s2362_s8 }
 0x9bf   :  { %p1841_p7 = pnand %p1839_p6, %p1836_p5 }
 0x9c1   :  { %1844 = shalt.err (!%p1841_p7)
}
 0x9c2   :  { %s1854_s10 = smov 128   ;;  %s1855_s30 = smov 8  }
 0x9c3   :  { %1250 = dma.vmem_to_hbm [thread:$0]  %s1245_s24, 512, %s2362_s8, [#allocation3], %s1854_s10, %s1854_s10, %s1855_s30  }
 0x9c4   :  { %1845 = dma.done.wait [#allocation3], 512  }
 0x9c5   :  { %1846 = vsyncadd [#allocation3], 4294966784 }
 0x9c6   :  { %1254 = vsyncpa [#allocation3], 1 }

</bundles_post_ra>
